<compile_context>
chip_gen: v7x
topology: tpu7x:2x2x1
jax: 0.10.0
libtpu: 0.0.40
codegen_flags: <defaults>
</compile_context>

<pallas_src>
import functools

import jax
import jax.numpy as jnp
from jax.experimental import pallas as pl
from jax.experimental.pallas import tpu as pltpu


_LANE = 128  # blocks are (1, r_tile, 128) contiguous slabs


def _block_byte_budget():
    """(target, cap) bytes per block; larger on v7x (3.2 TB/s HBM)."""
    try:
        kind = jax.devices()[0].device_kind.lower()
    except Exception:
        kind = ""
    if "v7" in kind:
        return 4 << 20, 8 << 20
    return 2 << 20, 4 << 20      # v5e / v6e: ~85%+ of HBM roofline at 1-2 MiB


def _sublane_step(dtype_bytes):
    # Sub-32-bit dtypes pack along sublanes: f32 vreg [8,128], bf16 [16,128],
    # int8/fp8 [32,128]; keep row tiles a multiple of the packed sublane count.
    return max(8, 32 // dtype_bytes)


def _row_tile(rows, dtype_bytes):
    """Rows per block: multiple of the sublane step, sized near the byte target."""
    target, cap = _block_byte_budget()
    sub = _sublane_step(dtype_bytes)
    row_bytes = _LANE * dtype_bytes
    tile = min(target, cap) // row_bytes
    tile = max(sub, (tile // sub) * sub)
    if rows <= tile:
        return rows, sub          # one full-dim block covers the sample
    return tile, sub


def _drop_path_kernel(keep_ref, x_ref, o_ref, *, inv_keep_prob):
    # keep_ref: SMEM (N,) int32 (1 = keep sample, 0 = drop).
    # x_ref / o_ref: VMEM (1, r_tile, 128) tile of the current sample.
    b = pl.program_id(0)
    scale = keep_ref[b].astype(jnp.float32) * inv_keep_prob
    # Multiply in f32; cast only the result (exact for f32, avoids quantizing
    # 1/keep_prob for bf16 or lower-precision inputs).
    o_ref[...] = (x_ref[...].astype(jnp.float32) * scale).astype(o_ref.dtype)


def drop_path(x, p, key, training=True):
    """Functional DropPath matching torch drop_path_ (JAX is non-in-place)."""
    if (not training) or p <= 0.0:
        return x
    if p >= 1.0:
        raise ValueError(f"drop_path probability must be < 1.0, got {p}")

    n = int(x.shape[0])
    payload = 1
    for d in x.shape[1:]:
        payload *= int(d)
    keep_prob = 1.0 - float(p)
    dtype_bytes = jnp.dtype(x.dtype).itemsize

    # Per-sample keep decision (scalar prefetch); 1/keep_prob is a constant.
    keep = jax.random.bernoulli(key, keep_prob, (n,)).astype(jnp.int32)

    # Flatten the per-sample payload into lane-dense (rows, 128) slabs; pad the
    # tail to a multiple of 128 so stores are unmasked and VMEM stays bounded.
    pad = (-payload) % _LANE
    rows = (payload + pad) // _LANE
    if pad:
        x3 = jnp.pad(x.reshape(n, payload), ((0, 0), (0, pad)))
        x3 = x3.reshape(n, rows, _LANE)
    else:
        x3 = x.reshape(n, rows, _LANE)

    r_tile, sub = _row_tile(rows, dtype_bytes)
    # Ensure >= 2 grid steps so megacore ("parallel","parallel") has work to
    # split across v7x's 2 TensorCores even when n == 1.
    if n * pl.cdiv(rows, r_tile) < 2 and rows > sub:
        half = pl.cdiv(rows, 2)
        r_tile = min(rows, max(sub, pl.cdiv(half, sub) * sub))

    grid = (n, pl.cdiv(rows, r_tile))          # ragged last row tile is fine
    block = (1, r_tile, _LANE)

    kernel = functools.partial(_drop_path_kernel, inv_keep_prob=1.0 / keep_prob)

    out = pl.pallas_call(
        kernel,
        out_shape=jax.ShapeDtypeStruct((n, rows, _LANE), x.dtype),
        grid_spec=pltpu.PrefetchScalarGridSpec(
            num_scalar_prefetch=1,
            grid=grid,
            in_specs=[
                # Dropped samples (keep==0) clamp every row tile to block 0, so
                # the pipeline dedups their input DMAs (~p of the read traffic
                # vanishes). The kernel still writes scale*x == 0 everywhere.
                pl.BlockSpec(block, lambda b, r, keep_ref: (b, r * keep_ref[b], 0)),
            ],
            out_specs=pl.BlockSpec(block, lambda b, r, keep_ref: (b, r, 0)),
        ),
        input_output_aliases={1: 0},      # in-place, like torch drop_path_
        compiler_params=pltpu.CompilerParams(
            dimension_semantics=("parallel", "parallel"),
            vmem_limit_bytes=32 * 1024 * 1024,
        ),
        cost_estimate=pl.CostEstimate(
            flops=n * rows * _LANE,
            transcendentals=0,
            bytes_accessed=2 * n * rows * _LANE * dtype_bytes,
        ),
    )(keep, x3)

    if pad:
        return out.reshape(n, rows * _LANE)[:, :payload].reshape(x.shape)
    return out.reshape(x.shape)


if __name__ == "__main__":
    key = jax.random.PRNGKey(0)
    kx, kmask = jax.random.split(key)

    N, C, H, W = 2, 4, 16, 16
    x = jax.random.normal(kx, (N, C, H, W), dtype=jnp.float32)
    p = 0.3
    keep_prob = 1.0 - p

    y = jax.block_until_ready(drop_path(x, p, kmask, training=True))

    # Pure-JAX reference with the identical mask draw and scale math.
    mask = jax.random.bernoulli(kmask, keep_prob, (N,))
    scale = mask.astype(jnp.float32) * jnp.float32(1.0 / keep_prob)
    ref = x * scale.reshape(N, 1, 1, 1)

    assert y.shape == x.shape and y.dtype == x.dtype
    assert jnp.allclose(y, ref, atol=1e-6, rtol=1e-6)

    # Payload not a multiple of 128 exercises the padding path.
    N2 = 3
    x2 = jax.random.normal(kx, (N2, 5, 9, 10), dtype=jnp.float32)   # payload=450
    y2 = jax.block_until_ready(drop_path(x2, p, kmask, training=True))
    mask2 = jax.random.bernoulli(kmask, keep_prob, (N2,))
    scale2 = mask2.astype(jnp.float32) * jnp.float32(1.0 / keep_prob)
    ref2 = x2 * scale2.reshape(N2, 1, 1, 1)
    assert y2.shape == x2.shape
    assert jnp.allclose(y2, ref2, atol=1e-6, rtol=1e-6)

    # Eval mode / p == 0 passes through unchanged.
    y_eval = jax.block_until_ready(drop_path(x, p, kmask, training=False))
    assert jnp.allclose(y_eval, x)
    y_p0 = jax.block_until_ready(drop_path(x, 0.0, kmask, training=True))
    assert jnp.allclose(y_p0, x)

    print("KERNEL_OK")
</pallas_src>

<mosaic_0001>
module attributes {stable_mosaic.version = 11 : i64} {
  func.func @_drop_path_kernel(%arg0: i32, %arg1: i32, %arg2: memref<2xi32, #tpu.memory_space<smem>>, %arg3: memref<1x8x128xf32, #tpu.memory_space<vmem>>, %arg4: memref<1x8x128xf32, #tpu.memory_space<vmem>>) attributes {dimension_semantics = [#tpu.dimension_semantics<parallel>, #tpu.dimension_semantics<parallel>], iteration_bounds = array<i64: 2, 1>, scalar_prefetch = 1 : i64, scratch_operands = 0 : i64, tpu.core_type = #tpu.core_type<tc>, window_params = [{transform_indices = @transform_0, window_bounds = array<i64: 1, 8, 128>}, {transform_indices = @transform_1, window_bounds = array<i64: 1, 8, 128>}]} {
    %0 = arith.index_cast %arg0 : i32 to index
    %1 = memref.load %arg2[%0] : memref<2xi32, #tpu.memory_space<smem>>
    %2 = arith.sitofp %1 : i32 to f32
    %cst = arith.constant 1.42857146 : f32
    %3 = arith.mulf %2, %cst : f32
    %c0 = arith.constant 0 : index
    %c0_0 = arith.constant 0 : index
    %c0_1 = arith.constant 0 : index
    %4 = vector.load %arg3[%c0, %c0_0, %c0_1] : memref<1x8x128xf32, #tpu.memory_space<vmem>>, vector<1x8x128xf32>
    %5 = vector.broadcast %3 : f32 to vector<1x8x128xf32>
    %6 = arith.mulf %4, %5 : vector<1x8x128xf32>
    %c0_2 = arith.constant 0 : index
    %c0_3 = arith.constant 0 : index
    %c0_4 = arith.constant 0 : index
    %7 = vector.load %arg4[%c0_2, %c0_3, %c0_4] : memref<1x8x128xf32, #tpu.memory_space<vmem>>, vector<1x8x128xf32>
    tpu.vector_store %arg4[%c0_2, %c0_3, %c0_4], %6 {strides = array<i32>} : memref<1x8x128xf32, #tpu.memory_space<vmem>>, vector<1x8x128xf32>,
    return
  }
  func.func @transform_0(%arg0: i32, %arg1: i32, %arg2: memref<2xi32, #tpu.memory_space<smem>>) -> (i32, i32, i32) {
    %0 = arith.index_cast %arg0 : i32 to index
    %1 = memref.load %arg2[%0] : memref<2xi32, #tpu.memory_space<smem>>
    %2 = arith.muli %arg1, %1 : i32
    %c0_i32 = arith.constant 0 : i32
    %c0_i32_0 = arith.constant 0 : i32
    return %arg0, %2, %c0_i32 : i32, i32, i32
  }
  func.func @transform_1(%arg0: i32, %arg1: i32, %arg2: memref<2xi32, #tpu.memory_space<smem>>) -> (i32, i32, i32) {
    %c0_i32 = arith.constant 0 : i32
    %c0_i32_0 = arith.constant 0 : i32
    return %arg0, %arg1, %c0_i32 : i32, i32, i32
  }
}

</mosaic_0001>

<bundles_post_ra>
// kernel: tpu_custom_call.1
= control target key start
LH: loop header
LB: loop body
LE: loop exit
PB: predicated region body
PF: predicated region fallthrough
CT: control target
= control target key end

     0   :  { %s664_s0 = inlined_call_operand.vmem [shape: s32[2], index: 0, kind: input, shape index: {}]   ;;  %s665_s1 = inlined_call_operand.hbm [shape: f32[2,8,128], index: 1, kind: input, shape index: {}, may-alias: {1,2}]   ;;  %s666_s2 = inlined_call_operand.hbm [shape: f32[2,8,128], index: 2, kind: output, shape index: {}, may-alias: {1,2}]  }
   0x1   :  { %s7_s11 = sshll.u32 %s664_s0, 4  ;;  %s8_s11 = int_to_ptr.vmem [resolvable:$true] %s7_s11 }
   0x2   :  { %s342_s12 = scalar_lea.vmem %s8_s11, 16  ;;  %p347_p1 = scmp.lt.s32.totalorder %s8_s11, %s8_s11 }
   0x3   :  { %p343_p0 = scmp.ne.s32.totalorder %s8_s11, %s342_s12  ;;  %p348_p2 = scmp.lt.s32.totalorder %s342_s12, %s342_s12 }
   0x5   :  { %p349_p3 = por %p348_p2, %p347_p1 }
   0x7   :  { %p350_p4 = pnand %p349_p3, %p343_p0 }
   0x9   :  { %353 = shalt.err (!%p350_p4)  }
   0xa   :  { %s470_s13 = smov [#allocation3]  }
   0xb   :  { %10 = dma.vmem_to_smem %s8_s11, 16, %s470_s13, [#allocation2] }
   0xc   :  { %436 = dma.done.wait [#allocation2], 16 }
   0xd   :  { %437 = vsyncadd [#allocation2], 4294967280 }
   0xe   :  { %12 = sfence }
   0xf   :  { %13 = vsyncpa [#allocation5], 0 }
  0x10   :  { %15 = vsyncpa [#allocation5 + $0x1], 0 }
  0x11   :  { %16 = vsyncpa [#allocation6], 0 }
  0x12   :  { %18 = vsyncpa [#allocation6 + $0x1], 0  ;;  %s491_s14 = smov 0   ;;  %s493_s0 = smov 0  }
  0x13   :  { %s495_s15 = smov 0   ;;  %s497_s16 = smov 0  }
  0x14   :  { %s499_s17 = smov 0   ;;  %s501_s18 = smov 0  }
  0x15 LB: > { %s266_s19 = sadd.s32 4294967295, %s468_s18   ;;  %s267_s20 = sadd.s32 4294967294, %s468_s18   ;;  %s468_s18 = sphi %s501_s18, %s24_s18   ;;  %s464_s17 = sphi %s499_s17, %s682_s17   ;;  %s460_s16 = sphi %s497_s16, %s681_s16   ;;  %s456_s15 = sphi %s495_s15, %s680_s15   ;;  %s452_s0 = sphi %s493_s0, %s679_s0   ;;  %s448_s14 = sphi %s491_s14, %s678_s14  }
  0x16   : > { %s36_s21 = sadd.s32 1, %s464_s17  ;;  %s49_s22 = sadd.s32 1, %s456_s15 }
  0x17   : > { %p38_p5 = scmp.ge.s32.totalorder %s36_s21, 2  ;;  %p56_p6 = scmp.ne.s32.totalorder %s456_s15, %s452_s0 }
  0x18   : > { %p57_p7 = scmp.eq.s32.totalorder %s468_s18, 0  ;;  %p62_p8 = scmp.ne.s32.totalorder %s452_s0, %s448_s14 }
  0x19   : > { %s684_s21 = smov (%p38_p5, %s36_s21), 0  ;;  %p63_p10 = scmp.eq.s32.totalorder %s266_s19, 0 }
  0x1a   : > { %p532_p9 = por %p57_p7, %p56_p6  ;;  %s44_s24 = ssub.s32 %s464_s17, %s684_s21 }
  0x1b   : > { %p88_p11 = scmp.eq.s32.totalorder %s266_s19, 1  ;;  %p47_p12 = scmp.eq.s32.totalorder %s44_s24, 0 }
  0x1c   : > { %p538_p13 = por %p63_p10, %p62_p8  ;;  %p94_p1 = scmp.eq.s32.totalorder %s267_s20, 1 }
  0x1d   : > { %p542_p0 = por %p88_p11, %p56_p6  ;;  %p291_p4 = scmp.lt.s32.totalorder %s468_s18, 2 }
  0x1e   : > { %s547_s27 = scalar_select %p47_p12, %s456_s15, %s49_s22  }
  0x1f   : > { %s670_s26 = scalar_select %p542_p0, 1, 0 }
  0x20   : > { %p549_p2 = por %p94_p1, %p62_p8  ;;  %s114_s29 = sand.u32 1, %s456_s15  }
  0x21   : > { %s270_s30 = sshll.u32 %s114_s29, 3  ;;  %s271_s3 = sshll.u32 %s464_s17, 7 }
  0x22   : > { %s671_s28 = scalar_select %p549_p2, 1, 0 }
  0x23   : > { %s560_s6 = scalar_lea.hbm %s665_s1, %s271_s3  ;;  %s118_s7 = scalar_lea.vmem [#allocation4], %s270_s30 }
  0x24   : > { %s128_s8 = sshll.u32 %s118_s7, 4  ;;  %p566_p5 = pnand %p291_p4, %p532_p9  ;;  %s562_s8 = int_to_ptr.vmem [resolvable:$true] %s128_s8 }
  0x25   : > { %s115_s10 = scalar_lea.sflag [#allocation5], %s114_s29  ;;  %s354_s11 = scalar_lea.hbm %s560_s6, 128 }
  0x26   : > { %p355_p8 = scmp.ne.s32.totalorder %s560_s6, %s354_s11  ;;  %p356_p10 = pneg %p566_p5 }
  0x27   : > { %s359_s19 = scalar_lea.hbm %s665_s1, 256  ;;  %p360_p9 = scmp.lt.u32.totalorder %s560_s6, %s665_s1 }
  0x28   : > { %p357_p11 = pnand %p356_p10, %p355_p8  ;;  %p361_p1 = scmp.lt.u32.totalorder %s359_s19, %s354_s11 }
  0x29   : > { %p363_p3 = scmp.lt.u32.totalorder %s354_s11, %s560_s6 }
  0x2a   : > { %p358_p12 = pneg %p357_p11  ;;  %p362_p4 = por %p361_p1, %p360_p9 }
  0x2c   : > { %p364_p6 = por %p363_p3, %p362_p4 }
  0x2e   : > { %p365_p7 = pnand %p364_p6, %p358_p12 }
  0x30   : > { %368 = shalt.err (!%p365_p7)
}
  0x31   : > { %s369_s23 = scalar_lea.vmem %s562_s8, 128  ;;  %s471_s24 = smov [#allocation4]  }
  0x32   : > { %p370_p8 = scmp.ne.s32.totalorder %s562_s8, %s369_s23  ;;  %s374_s29 = sshll.u32 %s471_s24, 4  ;;  %s375_s29 = int_to_ptr.vmem [resolvable:$false] %s374_s29 }
  0x33   : > { %s376_s30 = scalar_lea.vmem %s375_s29, 256  ;;  %p377_p0 = scmp.lt.s32.totalorder %s562_s8, %s375_s29 }
  0x34   : > { %p372_p11 = pnand %p370_p8, %p356_p10  ;;  %p378_p9 = scmp.lt.s32.totalorder %s376_s30, %s369_s23 }
  0x36   : > { %p373_p2 = pneg %p372_p11  ;;  %p379_p1 = por %p378_p9, %p377_p0 }
  0x38   : > { %p380_p3 = pnand %p379_p1, %p373_p2 }
  0x3a   : > { %383 = shalt.err (!%p380_p3)
}
  0x3b   : > { %286 = dma.hbm_to_vmem [thread:$0]  (!%p566_p5), %s560_s6, 128, %s562_s8, %s115_s10  }
  0x3c   : > { %p673_p6 = scmp.lt.s32.totalorder %s468_s18, 3  ;;  %p674_p7 = scmp.ge.s32.totalorder %s468_s18, 1 }
  0x3e   : > { %p134_p10 = pnand %p674_p7, %p673_p6 }
  0x3f   : > { %s602_s3 = sand.u32 (!%p134_p10), 1, %s452_s0  }
  0x40   : > { %137 = sbr.rel (%p134_p10) target bundleno = 100 (0x64), region = 24  ;;  %s273_s4 = sshll.u32 (!%p134_p10), %s602_s3, 3 }
  0x41   : > { %s140_s5 = scalar_lea.sflag (!%p134_p10), [#allocation5], %s602_s3  ;;  %s143_s7 = scalar_lea.vmem (!%p134_p10), [#allocation4], %s273_s4 }
  0x47   : > { %439 = dma.done.wait (%p538_p13), %s140_s5, 128  }
  0x48   : > { %441 = vsyncadd (%p538_p13), %s140_s5, 4294967168  ;;  %s164_s6 = sld [smem:[#allocation3 + %s460_s16]]  ;;  %s161_s9 = scalar_lea.vmem [#allocation7], %s273_s4  ;;  %v167_v0 = vld [vmem:[%s143_s7] sm:$0xff] }
  0x49   : > { %s186_s10 = sshll.u32 %s161_s9, 4  ;;  %s276_s12 = sshll.u32 %s460_s16, 7  ;;  %s612_s10 = int_to_ptr.vmem [resolvable:$true] %s186_s10 }
  0x4a   : > { %s617_s25 = scalar_lea.hbm %s666_s2, %s276_s12  ;;  %s172_s20 = scalar_lea.sflag [#allocation6], %s602_s3 }
  0x4b   : > { %s384_s22 = scalar_lea.vmem %s612_s10, 128  ;;  %p675_p0 = scmp.ne.s32.totalorder %s670_s26, 0 }
  0x4c   : > { %p385_p13 = scmp.ne.s32.totalorder %s612_s10, %s384_s22  ;;  %s472_s16 = smov [#allocation7]  }
  0x4d   : > { %s388_s23 = sshll.u32 %s472_s16, 4  ;;  %s389_s23 = int_to_ptr.vmem [resolvable:$false] %s388_s23 }
  0x4e   : > { %s165_s8 = scvt.s32.f32 %s164_s6  ;;  %p386_p2 = pnand %p385_p13, %p675_p0 }
  0x4f   : > { %s390_s24 = scalar_lea.vmem %s389_s23, 256  ;;  %p391_p12 = scmp.lt.s32.totalorder %s612_s10, %s389_s23 }
  0x50   : > { %s166_s11 = smul.f32 1.4285715, %s165_s8  ;;  %p387_p5 = pneg %p386_p2 }
  0x51   : > { %p392_p4 = scmp.lt.s32.totalorder %s390_s24, %s384_s22 }
  0x52   : > { %v168_v1 = vstv %s166_s11 }
  0x53   : > { %v169_v2 = vmul.f32 %v168_v1, %v167_v0  ;;  %p393_p8 = por %p392_p4, %p391_p12 }
  0x55   : > { %170 = vst [vmem:[%s161_s9] sm:$0xff] %v169_v2  ;;  %p394_p11 = pnand %p393_p8, %p387_p5 }
  0x57   : > { %397 = shalt.err (!%p394_p11)
}
  0x58   : > { %s398_s29 = scalar_lea.hbm %s617_s25, 128  ;;  %s402_s4 = scalar_lea.hbm %s666_s2, 256 }
  0x59   : > { %p399_p9 = scmp.ne.s32.totalorder %s617_s25, %s398_s29  ;;  %p403_p6 = scmp.lt.u32.totalorder %s617_s25, %s666_s2 }
  0x5a   : > { %p404_p7 = scmp.lt.u32.totalorder %s402_s4, %s398_s29  ;;  %p406_p13 = scmp.lt.u32.totalorder %s398_s29, %s617_s25 }
  0x5b   : > { %p400_p1 = pnand %p399_p9, %p675_p0 }
  0x5c   : > { %p405_p10 = por %p404_p7, %p403_p6 }
  0x5d   : > { %p401_p3 = pneg %p400_p1 }
  0x5e   : > { %p407_p2 = por %p406_p13, %p405_p10 }
  0x60   : > { %p408_p5 = pnand %p407_p2, %p401_p3 }
  0x62   : > { %411 = shalt.err (!%p408_p5)
}
  0x63   : > { %281 = dma.vmem_to_hbm [thread:$0]  (%p675_p0), %s612_s10, 128, %s617_s25, %s172_s20  }
  0x64 PF: > { %s198_s6 = sand.u32 1, %s448_s14   ;;  %p676_p12 = scmp.ne.s32.totalorder %s671_s28, 0 }
  0x65   : > { %p677_p4 = scmp.ge.s32.totalorder %s468_s18, 2  ;;  %s199_s8 = scalar_lea.sflag [#allocation6], %s198_s6 }
  0x67   : > { %p288_p8 = pnand %p677_p4, %p676_p12 }
  0x69   : > { %443 = dma.done.wait (!%p288_p8), %s199_s8, 128  }
  0x6a   : > { %445 = vsyncadd (!%p288_p8), %s199_s8, 4294967168  ;;  %s24_s18 = sadd.s32 1, %s468_s18   ;;  %s678_s14 = smov %s452_s0 }
  0x6b   : > { %p21_p11 = scmp.ge.s32.totalorder %s24_s18, 4   ;;  %s679_s0 = smov %s456_s15 }
  0x6c   : > { %s680_s15 = smov %s547_s27  ;;  %s681_s16 = smov %s464_s17 }
  0x6d   : > { %s682_s17 = smov %s684_s21  ;;  %23 = sbr.rel (!%p21_p11) target bundleno = 21 (0x15), region = 69 }
  0x74   :  { %204 = vsyncpa [#allocation5], 1 }
  0x75   :  { %206 = vsyncpa [#allocation5 + $0x1], 1 }
  0x76   :  { %207 = vsyncpa [#allocation6], 1 }
  0x77   :  { %209 = vsyncpa [#allocation6 + $0x1], 1 }

</bundles_post_ra>
